<compile_context>
chip_gen: v7x
topology: tpu7x:2x2x1
jax: 0.10.0
libtpu: 0.0.40
codegen_flags: <defaults>
</compile_context>

<pallas_src>
import functools
import math

import jax
import jax.numpy as jnp
from jax.experimental import pallas as pl
from jax.experimental.pallas import tpu as pltpu


def _round_up(x, m):
    return ((x + m - 1) // m) * m


def _cdiv(a, b):
    return (a + b - 1) // b


# ----------------------------------------------------------------------------
# Shared LayerNorm math (torch LayerNormalization semantics: mean over last
# dim, UNBIASED std (ddof=1), scalar alpha/bias).  The divide is done on the
# (rows, 1) column only; the (rows, D) work is VPU multiplies.
# ----------------------------------------------------------------------------
def _layer_norm(z, alpha, bias, eps):
    d = z.shape[-1]
    mean = jnp.mean(z, axis=-1, keepdims=True)
    var = jnp.sum((z - mean) ** 2, axis=-1, keepdims=True) / (d - 1)  # unbiased
    inv = 1.0 / (jnp.sqrt(var) + eps)          # column-only divide
    return (alpha * (z - mean)) * inv + bias


# ----------------------------------------------------------------------------
# Kernel 1a: fused embedding-gather -> *sqrt(d) + PE -> LayerNorm
# (embedding table fully resident in VMEM; gather = dynamic row copies).
# ----------------------------------------------------------------------------
def embed_posenc_ln_kernel(ids_ref,        # scalar-prefetch: (B, Sp) int32, SMEM
                           emb_ref,        # (vocab, D) f32, VMEM (whole table)
                           pe_ref,         # (t_seq, D) f32, VMEM tile
                           alpha_ref,      # (1, 1) f32, SMEM
                           bias_ref,       # (1, 1) f32, SMEM
                           o_ref,          # (1, t_seq, D) f32, VMEM tile
                           gat_ref,        # scratch (t_seq, D) f32
                           *, scale, eps, t_seq):
    b = pl.program_id(0)
    s0 = pl.program_id(1) * t_seq

    # Gather t_seq rows from the VMEM-resident table (no per-row HBM DMAs).
    @pl.loop(0, t_seq)
    def _gather(t):
        tok = ids_ref[b, s0 + t]
        gat_ref[pl.ds(t, 1), :] = emb_ref[pl.ds(tok, 1), :]

    z = gat_ref[...] * scale + pe_ref[...]
    o_ref[0, :, :] = _layer_norm(z, alpha_ref[0, 0], bias_ref[0, 0], eps)


# Kernel 1b: PE + LayerNorm on pre-gathered activations (large-table fallback).
def posenc_ln_kernel(x_ref, pe_ref, alpha_ref, bias_ref, o_ref, *, scale, eps):
    z = x_ref[0, :, :] * scale + pe_ref[...]
    o_ref[0, :, :] = _layer_norm(z, alpha_ref[0, 0], bias_ref[0, 0], eps)


# Table (x2 buffers) must stay well inside v7x's 64 MiB VMEM.
_EMB_VMEM_BUDGET = 4 * 1024 * 1024


def embed_posenc_layernorm(ids, emb_table, pe_table, alpha, bias, *, scale,
                           eps=1e-6):
    B, S = ids.shape
    vocab, D = emb_table.shape
    ids = ids.astype(jnp.int32)

    t_seq = min(256, _round_up(S, 8))
    Sp = _round_up(S, t_seq)
    ids_p = jnp.pad(ids, ((0, 0), (0, Sp - S))) if Sp != S else ids   # token 0 is valid
    pe_rows = pe_table[:S]
    pe_p = jnp.pad(pe_rows, ((0, Sp - S), (0, 0))) if Sp != S else pe_rows

    grid = (B, Sp // t_seq)
    cparams = pltpu.CompilerParams(
        dimension_semantics=("parallel", "parallel"),
        vmem_limit_bytes=32 * 1024 * 1024,
    )

    table_bytes = vocab * D * emb_table.dtype.itemsize
    if table_bytes <= _EMB_VMEM_BUDGET:
        kernel = functools.partial(embed_posenc_ln_kernel, scale=scale,
                                   eps=eps, t_seq=t_seq)
        out = pl.pallas_call(
            kernel,
            out_shape=jax.ShapeDtypeStruct((B, Sp, D), jnp.float32),
            grid_spec=pltpu.PrefetchScalarGridSpec(
                num_scalar_prefetch=1,
                grid=grid,
                in_specs=[
                    pl.BlockSpec((vocab, D), lambda b, s, ids: (0, 0)),   # table, resident
                    pl.BlockSpec((t_seq, D), lambda b, s, ids: (s, 0)),   # PE rows (no B bcast)
                    pl.BlockSpec(memory_space=pltpu.MemorySpace.SMEM),    # alpha (1,1)
                    pl.BlockSpec(memory_space=pltpu.MemorySpace.SMEM),    # bias  (1,1)
                ],
                out_specs=pl.BlockSpec((1, t_seq, D), lambda b, s, ids: (b, s, 0)),
                scratch_shapes=[pltpu.VMEM((t_seq, D), jnp.float32)],
            ),
            compiler_params=cparams,
        )(ids_p, emb_table, pe_p, alpha, bias)
    else:
        # TODO(synk): large-vocab path gathers rows with an XLA gather; an
        # in-kernel double-buffered DMA gather would avoid this HBM intermediate.
        x = jnp.take(emb_table, ids_p, axis=0)               # (B, Sp, D)
        kernel = functools.partial(posenc_ln_kernel, scale=scale, eps=eps)
        out = pl.pallas_call(
            kernel,
            out_shape=jax.ShapeDtypeStruct((B, Sp, D), jnp.float32),
            grid=grid,
            in_specs=[
                pl.BlockSpec((1, t_seq, D), lambda b, s: (b, s, 0)),
                pl.BlockSpec((t_seq, D), lambda b, s: (s, 0)),
                pl.BlockSpec(memory_space=pltpu.MemorySpace.SMEM),
                pl.BlockSpec(memory_space=pltpu.MemorySpace.SMEM),
            ],
            out_specs=pl.BlockSpec((1, t_seq, D), lambda b, s: (b, s, 0)),
            compiler_params=cparams,
        )(x, pe_p, alpha, bias)

    return out if Sp == S else out[:, :S, :]


# ----------------------------------------------------------------------------
# Kernel 2a: ProjectionLayer pass 1 — tiled bf16 MXU matmul, streamed
# lane-dense (t_r, t_v) raw-logit tiles, online logsumexp in (t_r, 1) scratch.
# ----------------------------------------------------------------------------
def proj_logits_kernel(x_ref, w_ref, b_ref, logits_ref, lse_ref, m_ref, l_ref):
    v = pl.program_id(1)

    @pl.when(v == 0)
    def _init():
        m_ref[...] = jnp.full_like(m_ref, -jnp.inf)
        l_ref[...] = jnp.zeros_like(l_ref)

    # bf16 weights (stored bf16 at init), bf16 activations, f32 accumulation.
    logits = jnp.dot(x_ref[...].astype(jnp.bfloat16), w_ref[...],
                     preferred_element_type=jnp.float32) + b_ref[...]
    logits_ref[...] = logits                               # lane-dense streamed store

    m_prev = m_ref[...]
    m_new = jnp.maximum(m_prev, jnp.max(logits, axis=-1, keepdims=True))
    l_ref[...] = (l_ref[...] * jnp.exp(m_prev - m_new)
                  + jnp.sum(jnp.exp(logits - m_new), axis=-1, keepdims=True))
    m_ref[...] = m_new

    @pl.when(v == pl.num_programs(1) - 1)
    def _finalize():
        lse_ref[...] = m_ref[...] + jnp.log(l_ref[...])


# Kernel 2b: tiny normalization pass, out = raw_logits - lse (lane-dense tiles).
def sub_lse_kernel(logits_ref, lse_ref, o_ref):
    o_ref[...] = logits_ref[...] - lse_ref[...]


def project_log_softmax(x2d, w_t_bf16, bias_vec):
    R, D = x2d.shape
    V = w_t_bf16.shape[1]

    # Vocab tiling: pad V to a 128-multiple (never a (D, V) single block).
    Vp = _round_up(V, 128)
    t_v = 128
    for cand in (2048, 1024, 512, 256):
        if Vp % cand == 0:
            t_v = cand
            break
    n_v = Vp // t_v

    # Row tiling: prefer >= 2 row blocks (both v7x TensorCores busy); larger
    # tiles amortize re-streaming of the (D, Vp) weight (v5e/v6e HBM roofline).
    if R <= 8:
        t_r = 8
    elif R >= 512:
        t_r = 256
    else:
        t_r = _round_up(_cdiv(R, 2), 8)
    Rp = _round_up(R, t_r)
    n_r = Rp // t_r

    x_p = jnp.pad(x2d, ((0, Rp - R), (0, 0))) if Rp != R else x2d
    w_p = jnp.pad(w_t_bf16, ((0, 0), (0, Vp - V))) if Vp != V else w_t_bf16
    b_vec = bias_vec.astype(jnp.float32)
    if Vp != V:
        # -inf bias on padded columns -> exp() contributes 0 to the logsumexp.
        b_vec = jnp.pad(b_vec, (0, Vp - V), constant_values=-jnp.inf)
    b_row = b_vec.reshape(1, Vp)

    vmem_est = (2 * t_r * D * 4 + 2 * D * t_v * 2 + 2 * t_r * t_v * 4
                + 4 * t_r * 4 + (4 << 20))
    vmem_limit = int(min(max(vmem_est, 16 << 20), 60 << 20))

    raw, lse = pl.pallas_call(
        proj_logits_kernel,
        out_shape=(jax.ShapeDtypeStruct((Rp, Vp), jnp.float32),
                   jax.ShapeDtypeStruct((Rp, 1), jnp.float32)),
        grid=(n_r, n_v),
        in_specs=[
            pl.BlockSpec((t_r, D), lambda r, v: (r, 0)),    # activations
            pl.BlockSpec((D, t_v), lambda r, v: (0, v)),    # bf16 weight tiles
            pl.BlockSpec((1, t_v), lambda r, v: (0, v)),    # bias tiles
        ],
        out_specs=(pl.BlockSpec((t_r, t_v), lambda r, v: (r, v)),   # raw logits
                   pl.BlockSpec((t_r, 1), lambda r, v: (r, 0))),    # per-row lse
        scratch_shapes=[pltpu.VMEM((t_r, 1), jnp.float32),          # running max
                        pltpu.VMEM((t_r, 1), jnp.float32)],         # running sum
        compiler_params=pltpu.CompilerParams(
            dimension_semantics=("parallel", "arbitrary"),
            vmem_limit_bytes=vmem_limit,
        ),
    )(x_p, w_p, b_row)

    out = pl.pallas_call(
        sub_lse_kernel,
        out_shape=jax.ShapeDtypeStruct((Rp, Vp), jnp.float32),
        grid=(n_r, n_v),
        in_specs=[
            pl.BlockSpec((t_r, t_v), lambda r, v: (r, v)),
            pl.BlockSpec((t_r, 1), lambda r, v: (r, 0)),
        ],
        out_specs=pl.BlockSpec((t_r, t_v), lambda r, v: (r, v)),
        compiler_params=pltpu.CompilerParams(
            dimension_semantics=("parallel", "parallel")),
    )(raw, lse)

    if Rp != R or Vp != V:
        out = out[:R, :V]
    return out


# ----------------------------------------------------------------------------
# Positional encoding table (exactly as PositionalEncoding.__init__; note it
# uses log(1000.0), as written in the reference source).
# ----------------------------------------------------------------------------
def make_positional_encoding(seq_len, d_model):
    position = jnp.arange(seq_len, dtype=jnp.float32)[:, None]
    div_term = jnp.exp(jnp.arange(0, d_model, 2, dtype=jnp.float32)
                       * (-math.log(1000.0) / d_model))
    pe = jnp.zeros((seq_len, d_model), jnp.float32)
    pe = pe.at[:, 0::2].set(jnp.sin(position * div_term))
    pe = pe.at[:, 1::2].set(jnp.cos(position * div_term))
    return pe


# ----------------------------------------------------------------------------
# Full Transformer forward.
# ----------------------------------------------------------------------------
@jax.jit
def transformer_forward(params, src, tgt, src_mask, tgt_mask):
    # Masks are accepted for API parity; with zero encoder/decoder layers there
    # are no attention sub-layers, so they are unused.
    del src_mask, tgt_mask
    d_model = params["tgt_emb"].shape[1]
    scale = math.sqrt(d_model)
    B, St = tgt.shape

    # Encoder (0 layers == final LayerNorm only).  Its output is never
    # consumed by the 0-layer decoder, so it is not computed: the returned
    # value is identical, and we do not rely on XLA DCE of a pallas_call.
    del src

    # --- decode ---  (Decoder with 0 layers == final LayerNorm)
    decoder_output = embed_posenc_layernorm(
        tgt, params["tgt_emb"], params["pe_tgt"],
        params["dec_ln_alpha"], params["dec_ln_bias"], scale=scale)

    # --- project ---
    V = params["proj_w_t"].shape[1]
    out2d = project_log_softmax(
        decoder_output.reshape(B * St, d_model),
        params["proj_w_t"], params["proj_b"])
    return out2d.reshape(B, St, V)


# ----------------------------------------------------------------------------
# Deterministic parameter construction (shapes implied by module __init__).
# ----------------------------------------------------------------------------
def init_params(key, d_model, src_vocab, tgt_vocab, max_seq_len):
    k1, k2, k3, k4 = jax.random.split(key, 4)
    bound = 1.0 / math.sqrt(d_model)                 # nn.Linear default init range
    proj_w = jax.random.uniform(k3, (tgt_vocab, d_model), jnp.float32,
                                minval=-bound, maxval=bound)   # nn.Linear layout (V,D)
    return {
        "src_emb": jax.random.normal(k1, (src_vocab, d_model), jnp.float32),
        "tgt_emb": jax.random.normal(k2, (tgt_vocab, d_model), jnp.float32),
        "pe_src": make_positional_encoding(max_seq_len, d_model),
        "pe_tgt": make_positional_encoding(max_seq_len, d_model),
        # LayerNormalization: alpha = ones(1), bias = zeros(1)  (scalars)
        "enc_ln_alpha": jnp.ones((1, 1), jnp.float32),
        "enc_ln_bias": jnp.zeros((1, 1), jnp.float32),
        "dec_ln_alpha": jnp.ones((1, 1), jnp.float32),
        "dec_ln_bias": jnp.zeros((1, 1), jnp.float32),
        # ProjectionLayer weight: pre-transposed ONCE and stored in bf16
        # (MXU path is bf16 anyway; halves W HBM streaming).
        "proj_w_t": jnp.asarray(proj_w.T, dtype=jnp.bfloat16),   # (D, V)
        "proj_b": jax.random.uniform(k4, (tgt_vocab,), jnp.float32,
                                     minval=-bound, maxval=bound),
    }


# ----------------------------------------------------------------------------
# Pure-JAX reference (same bf16 matmul path as the kernel).
# ----------------------------------------------------------------------------
def reference_forward(params, src, tgt):
    d = params["tgt_emb"].shape[1]
    scale = math.sqrt(d)

    def emb_pe_ln(ids, table, pe, a, b):
        s = ids.shape[1]
        x = jnp.take(table, ids, axis=0) * scale + pe[None, :s, :]
        mean = x.mean(-1, keepdims=True)
        var = jnp.sum((x - mean) ** 2, -1, keepdims=True) / (d - 1)
        std = jnp.sqrt(var)
        return a[0, 0] * (x - mean) / (std + 1e-6) + b[0, 0]

    dec = emb_pe_ln(tgt, params["tgt_emb"], params["pe_tgt"],
                    params["dec_ln_alpha"], params["dec_ln_bias"])
    logits = jnp.dot(dec.astype(jnp.bfloat16),
                     params["proj_w_t"].astype(jnp.bfloat16),
                     preferred_element_type=jnp.float32) + params["proj_b"]
    return jax.nn.log_softmax(logits, axis=-1)


if __name__ == "__main__":
    B = 2
    SEQ = 8
    D_MODEL = 32         # toy shape; production D should be a multiple of 128
    SRC_VOCAB = 64
    TGT_VOCAB = 384      # 384 = 3 * 128 -> exercises the V-tiled projection path

    key = jax.random.PRNGKey(0)
    kp, ks, kt = jax.random.split(key, 3)

    params = init_params(kp, D_MODEL, SRC_VOCAB, TGT_VOCAB, SEQ)

    src = jax.random.randint(ks, (B, SEQ), 0, SRC_VOCAB, dtype=jnp.int32)
    tgt = jax.random.randint(kt, (B, SEQ), 0, TGT_VOCAB, dtype=jnp.int32)
    src_mask = jnp.ones((B, SEQ, SEQ), jnp.float32)
    tgt_mask = jnp.tril(jnp.ones((SEQ, SEQ), jnp.float32))[None].repeat(B, 0)

    out = transformer_forward(params, src, tgt, src_mask, tgt_mask)
    out = jax.block_until_ready(out)

    assert out.shape == (B, SEQ, TGT_VOCAB), out.shape
    # log_softmax rows must sum to 1 in probability space
    assert bool(jnp.allclose(jnp.sum(jnp.exp(out), axis=-1), 1.0, atol=1e-4))
    # compare against a pure-JAX reference (same bf16 matmul path)
    ref = reference_forward(params, src, tgt)
    max_err = float(jnp.max(jnp.abs(out - ref)))
    assert max_err < 5e-2, max_err
    print("KERNEL_OK")
</pallas_src>

<mosaic_0001>
module attributes {stable_mosaic.version = 11 : i64} {
  func.func @proj_logits_kernel(%arg0: i32, %arg1: i32, %arg2: memref<8x32xf32, #tpu.memory_space<vmem>>, %arg3: memref<32x128xbf16, #tpu.memory_space<vmem>>, %arg4: memref<1x128xf32, #tpu.memory_space<vmem>>, %arg5: memref<8x128xf32, #tpu.memory_space<vmem>>, %arg6: memref<8x1xf32, #tpu.memory_space<vmem>>, %arg7: memref<8x1xf32, #tpu.memory_space<vmem>>, %arg8: memref<8x1xf32, #tpu.memory_space<vmem>>) attributes {dimension_semantics = [#tpu.dimension_semantics<parallel>, #tpu.dimension_semantics<arbitrary>], iteration_bounds = array<i64: 2, 3>, scalar_prefetch = 0 : i64, scratch_operands = 2 : i64, tpu.core_type = #tpu.core_type<tc>, window_params = [{transform_indices = @transform_0, window_bounds = array<i64: 8, 32>}, {transform_indices = @transform_1, window_bounds = array<i64: 32, 128>}, {transform_indices = @transform_2, window_bounds = array<i64: 1, 128>}, {transform_indices = @transform_3, window_bounds = array<i64: 8, 128>}, {transform_indices = @transform_4, window_bounds = array<i64: 8, 1>}]} {
    %c0_i32 = arith.constant 0 : i32
    %0 = arith.cmpi eq, %arg1, %c0_i32 : i32
    %1 = arith.extui %0 : i1 to i32
    %c0_i32_0 = arith.constant 0 : i32
    %2 = arith.cmpi ne, %1, %c0_i32_0 : i32
    scf.if %2 {
      %cst_19 = arith.constant 0xFF800000 : f32
      %30 = vector.broadcast %cst_19 : f32 to vector<8x1xf32>
      %c0_20 = arith.constant 0 : index
      %c0_21 = arith.constant 0 : index
      %31 = vector.load %arg7[%c0_20, %c0_21] : memref<8x1xf32, #tpu.memory_space<vmem>>, vector<8x1xf32>
      tpu.vector_store %arg7[%c0_20, %c0_21], %30 {strides = array<i32>} : memref<8x1xf32, #tpu.memory_space<vmem>>, vector<8x1xf32>,
      %cst_22 = arith.constant 0.000000e+00 : f32
      %32 = vector.broadcast %cst_22 : f32 to vector<8x1xf32>
      %c0_23 = arith.constant 0 : index
      %c0_24 = arith.constant 0 : index
      %33 = vector.load %arg8[%c0_23, %c0_24] : memref<8x1xf32, #tpu.memory_space<vmem>>, vector<8x1xf32>
      tpu.vector_store %arg8[%c0_23, %c0_24], %32 {strides = array<i32>} : memref<8x1xf32, #tpu.memory_space<vmem>>, vector<8x1xf32>,
    } else {
    }
    %c0 = arith.constant 0 : index
    %c0_1 = arith.constant 0 : index
    %3 = vector.load %arg2[%c0, %c0_1] : memref<8x32xf32, #tpu.memory_space<vmem>>, vector<8x32xf32>
    %4 = arith.truncf %3 : vector<8x32xf32> to vector<8x32xbf16>
    %c0_2 = arith.constant 0 : index
    %c0_3 = arith.constant 0 : index
    %5 = vector.load %arg3[%c0_2, %c0_3] : memref<32x128xbf16, #tpu.memory_space<vmem>>, vector<32x128xbf16>
    %cst = arith.constant dense<0.000000e+00> : vector<8x128xf32>
    %6 = tpu.matmul %4, %5, %cst {dimension_numbers = #tpu.dot_dimension_numbers<[1], [0], [0], [1], [0, 0, 1, 1], [], []>} : vector<8x32xbf16>, vector<32x128xbf16>, vector<8x128xf32> -> vector<8x128xf32>
    %c0_4 = arith.constant 0 : index
    %c0_5 = arith.constant 0 : index
    %7 = vector.load %arg4[%c0_4, %c0_5] : memref<1x128xf32, #tpu.memory_space<vmem>>, vector<1x128xf32>
    %8 = vector.broadcast %7 : vector<1x128xf32> to vector<8x128xf32>
    %9 = arith.addf %6, %8 : vector<8x128xf32>
    %c0_6 = arith.constant 0 : index
    %c0_7 = arith.constant 0 : index
    %10 = vector.load %arg5[%c0_6, %c0_7] : memref<8x128xf32, #tpu.memory_space<vmem>>, vector<8x128xf32>
    tpu.vector_store %arg5[%c0_6, %c0_7], %9 {strides = array<i32>} : memref<8x128xf32, #tpu.memory_space<vmem>>, vector<8x128xf32>,
    %c0_8 = arith.constant 0 : index
    %c0_9 = arith.constant 0 : index
    %11 = vector.load %arg7[%c0_8, %c0_9] : memref<8x1xf32, #tpu.memory_space<vmem>>, vector<8x1xf32>
    %cst_10 = arith.constant dense<0xFF800000> : vector<8xf32>
    %12 = vector.multi_reduction <maximumf>, %9, %cst_10 [1] : vector<8x128xf32> to vector<8xf32>
    %13 = vector.shape_cast %12 : vector<8xf32> to vector<8x1xf32>
    %14 = arith.maximumf %11, %13 : vector<8x1xf32>
    %c0_11 = arith.constant 0 : index
    %c0_12 = arith.constant 0 : index
    %15 = vector.load %arg8[%c0_11, %c0_12] : memref<8x1xf32, #tpu.memory_space<vmem>>, vector<8x1xf32>
    %16 = arith.subf %11, %14 : vector<8x1xf32>
    %17 = math.exp %16 : vector<8x1xf32>
    %18 = arith.mulf %15, %17 : vector<8x1xf32>
    %19 = vector.broadcast %14 : vector<8x1xf32> to vector<8x128xf32>
    %20 = arith.subf %9, %19 : vector<8x128xf32>
    %21 = math.exp %20 : vector<8x128xf32>
    %cst_13 = arith.constant dense<0.000000e+00> : vector<8xf32>
    %22 = vector.multi_reduction <add>, %21, %cst_13 [1] : vector<8x128xf32> to vector<8xf32>
    %23 = vector.shape_cast %22 : vector<8xf32> to vector<8x1xf32>
    %24 = arith.addf %18, %23 : vector<8x1xf32>
    %c0_14 = arith.constant 0 : index
    %c0_15 = arith.constant 0 : index
    %25 = vector.load %arg8[%c0_14, %c0_15] : memref<8x1xf32, #tpu.memory_space<vmem>>, vector<8x1xf32>
    tpu.vector_store %arg8[%c0_14, %c0_15], %24 {strides = array<i32>} : memref<8x1xf32, #tpu.memory_space<vmem>>, vector<8x1xf32>,
    %c0_16 = arith.constant 0 : index
    %c0_17 = arith.constant 0 : index
    %26 = vector.load %arg7[%c0_16, %c0_17] : memref<8x1xf32, #tpu.memory_space<vmem>>, vector<8x1xf32>
    tpu.vector_store %arg7[%c0_16, %c0_17], %14 {strides = array<i32>} : memref<8x1xf32, #tpu.memory_space<vmem>>, vector<8x1xf32>,
    %c2_i32 = arith.constant 2 : i32
    %27 = arith.cmpi eq, %arg1, %c2_i32 : i32
    %28 = arith.extui %27 : i1 to i32
    %c0_i32_18 = arith.constant 0 : i32
    %29 = arith.cmpi ne, %28, %c0_i32_18 : i32
    scf.if %29 {
      %c0_19 = arith.constant 0 : index
      %c0_20 = arith.constant 0 : index
      %30 = vector.load %arg7[%c0_19, %c0_20] : memref<8x1xf32, #tpu.memory_space<vmem>>, vector<8x1xf32>
      %c0_21 = arith.constant 0 : index
      %c0_22 = arith.constant 0 : index
      %31 = vector.load %arg8[%c0_21, %c0_22] : memref<8x1xf32, #tpu.memory_space<vmem>>, vector<8x1xf32>
      %32 = math.log %31 : vector<8x1xf32>
      %33 = arith.addf %30, %32 : vector<8x1xf32>
      %c0_23 = arith.constant 0 : index
      %c0_24 = arith.constant 0 : index
      %34 = vector.load %arg6[%c0_23, %c0_24] : memref<8x1xf32, #tpu.memory_space<vmem>>, vector<8x1xf32>
      tpu.vector_store %arg6[%c0_23, %c0_24], %33 {strides = array<i32>} : memref<8x1xf32, #tpu.memory_space<vmem>>, vector<8x1xf32>,
    } else {
    }
    return
  }
  func.func @transform_0(%arg0: i32, %arg1: i32) -> (i32, i32) {
    %c0_i32 = arith.constant 0 : i32
    %c0_i32_0 = arith.constant 0 : i32
    return %arg0, %c0_i32 : i32, i32
  }
  func.func @transform_1(%arg0: i32, %arg1: i32) -> (i32, i32) {
    %c0_i32 = arith.constant 0 : i32
    %c0_i32_0 = arith.constant 0 : i32
    return %c0_i32, %arg1 : i32, i32
  }
  func.func @transform_2(%arg0: i32, %arg1: i32) -> (i32, i32) {
    %c0_i32 = arith.constant 0 : i32
    %c0_i32_0 = arith.constant 0 : i32
    return %c0_i32, %arg1 : i32, i32
  }
  func.func @transform_3(%arg0: i32, %arg1: i32) -> (i32, i32) {
    %c0_i32 = arith.constant 0 : i32
    return %arg0, %arg1 : i32, i32
  }
  func.func @transform_4(%arg0: i32, %arg1: i32) -> (i32, i32) {
    %c0_i32 = arith.constant 0 : i32
    %c0_i32_0 = arith.constant 0 : i32
    return %arg0, %c0_i32 : i32, i32
  }
}

module attributes {stable_mosaic.version = 11 : i64} {
  func.func @embed_posenc_ln_kernel(%arg0: i32, %arg1: i32, %arg2: memref<2x8xi32, #tpu.memory_space<smem>>, %arg3: memref<384x32xf32, #tpu.memory_space<vmem>>, %arg4: memref<8x32xf32, #tpu.memory_space<vmem>>, %arg5: memref<1x1xf32, #tpu.memory_space<smem>>, %arg6: memref<1x1xf32, #tpu.memory_space<smem>>, %arg7: memref<1x8x32xf32, #tpu.memory_space<vmem>>, %arg8: memref<8x32xf32, #tpu.memory_space<vmem>>) attributes {dimension_semantics = [#tpu.dimension_semantics<parallel>, #tpu.dimension_semantics<parallel>], iteration_bounds = array<i64: 2, 1>, scalar_prefetch = 1 : i64, scratch_operands = 1 : i64, tpu.core_type = #tpu.core_type<tc>, window_params = [{pipeline_mode = #tpu.pipeline_mode<synchronous>, transform_indices = @transform_0, window_bounds = array<i64: 384, 32>}, {transform_indices = @transform_1, window_bounds = array<i64: 8, 32>}, {transform_indices = @transform_2, window_bounds = array<i64: 1, 1>}, {transform_indices = @transform_3, window_bounds = array<i64: 1, 1>}, {transform_indices = @transform_4, window_bounds = array<i64: 1, 8, 32>}]} {
    %c8_i32 = arith.constant 8 : i32
    %0 = arith.muli %arg1, %c8_i32 : i32
    %c0_i32 = arith.constant 0 : i32
    %c8_i32_0 = arith.constant 8 : i32
    %1 = arith.addi %c0_i32, %c8_i32_0 : i32
    %c1_i32 = arith.constant 1 : i32
    scf.for %arg9 = %c0_i32 to %1 step %c1_i32  : i32 {
      %c1_i32_18 = arith.constant 1 : i32
      %36 = arith.muli %arg9, %c1_i32_18 : i32
      %c0_i32_19 = arith.constant 0 : i32
      %37 = arith.addi %c0_i32_19, %36 : i32
      %38 = arith.addi %0, %37 : i32
      %39 = arith.index_cast %arg0 : i32 to index
      %40 = arith.index_cast %38 : i32 to index
      %41 = memref.load %arg2[%39, %40] : memref<2x8xi32, #tpu.memory_space<smem>>
      %42 = arith.index_cast %41 : i32 to index
      %c0_20 = arith.constant 0 : index
      %43 = vector.load %arg3[%42, %c0_20] : memref<384x32xf32, #tpu.memory_space<vmem>>, vector<1x32xf32>
      %44 = arith.index_cast %37 : i32 to index
      %c0_21 = arith.constant 0 : index
      %45 = vector.load %arg8[%44, %c0_21] : memref<8x32xf32, #tpu.memory_space<vmem>>, vector<1x32xf32>
      tpu.vector_store %arg8[%44, %c0_21], %43 {strides = array<i32>} : memref<8x32xf32, #tpu.memory_space<vmem>>, vector<1x32xf32>,
    }
    %c8_i32_1 = arith.constant 8 : i32
    %c0 = arith.constant 0 : index
    %c0_2 = arith.constant 0 : index
    %2 = vector.load %arg8[%c0, %c0_2] : memref<8x32xf32, #tpu.memory_space<vmem>>, vector<8x32xf32>
    %cst = arith.constant 5.65685415 : f32
    %3 = vector.broadcast %cst : f32 to vector<8x32xf32>
    %4 = arith.mulf %2, %3 : vector<8x32xf32>
    %c0_3 = arith.constant 0 : index
    %c0_4 = arith.constant 0 : index
    %5 = vector.load %arg4[%c0_3, %c0_4] : memref<8x32xf32, #tpu.memory_space<vmem>>, vector<8x32xf32>
    %6 = arith.addf %4, %5 : vector<8x32xf32>
    %c0_5 = arith.constant 0 : index
    %c0_6 = arith.constant 0 : index
    %7 = memref.load %arg5[%c0_5, %c0_6] : memref<1x1xf32, #tpu.memory_space<smem>>
    %c0_7 = arith.constant 0 : index
    %c0_8 = arith.constant 0 : index
    %8 = memref.load %arg6[%c0_7, %c0_8] : memref<1x1xf32, #tpu.memory_space<smem>>
    %cst_9 = arith.constant dense<0.000000e+00> : vector<8xf32>
    %9 = vector.multi_reduction <add>, %6, %cst_9 [1] : vector<8x32xf32> to vector<8xf32>
    %10 = vector.shape_cast %9 : vector<8xf32> to vector<8x1xf32>
    %cst_10 = arith.constant 3.200000e+01 : f32
    %11 = vector.broadcast %cst_10 : f32 to vector<8x1xf32>
    %12 = arith.divf %10, %11 : vector<8x1xf32>
    %13 = vector.broadcast %12 : vector<8x1xf32> to vector<8x32xf32>
    %14 = arith.subf %6, %13 : vector<8x32xf32>
    %15 = arith.mulf %14, %14 : vector<8x32xf32>
    %cst_11 = arith.constant dense<0.000000e+00> : vector<8xf32>
    %16 = vector.multi_reduction <add>, %15, %cst_11 [1] : vector<8x32xf32> to vector<8xf32>
    %17 = vector.shape_cast %16 : vector<8xf32> to vector<8x1xf32>
    %cst_12 = arith.constant 3.100000e+01 : f32
    %18 = vector.broadcast %cst_12 : f32 to vector<8x1xf32>
    %19 = arith.divf %17, %18 : vector<8x1xf32>
    %20 = math.sqrt %19 : vector<8x1xf32>
    %cst_13 = arith.constant 9.99999997E-7 : f32
    %21 = vector.broadcast %cst_13 : f32 to vector<8x1xf32>
    %22 = arith.addf %20, %21 : vector<8x1xf32>
    %cst_14 = arith.constant 1.000000e+00 : f32
    %23 = vector.broadcast %cst_14 : f32 to vector<8x1xf32>
    %24 = arith.divf %23, %22 : vector<8x1xf32>
    %25 = vector.broadcast %12 : vector<8x1xf32> to vector<8x32xf32>
    %26 = arith.subf %6, %25 : vector<8x32xf32>
    %27 = vector.broadcast %7 : f32 to vector<8x32xf32>
    %28 = arith.mulf %27, %26 : vector<8x32xf32>
    %29 = vector.broadcast %24 : vector<8x1xf32> to vector<8x32xf32>
    %30 = arith.mulf %28, %29 : vector<8x32xf32>
    %31 = vector.broadcast %8 : f32 to vector<8x32xf32>
    %32 = arith.addf %30, %31 : vector<8x32xf32>
    %c0_15 = arith.constant 0 : index
    %c0_16 = arith.constant 0 : index
    %c0_17 = arith.constant 0 : index
    %33 = vector.load %arg7[%c0_15, %c0_16, %c0_17] : memref<1x8x32xf32, #tpu.memory_space<vmem>>, vector<1x8x32xf32>
    %34 = vector.shape_cast %33 : vector<1x8x32xf32> to vector<8x32xf32>
    %35 = vector.shape_cast %32 : vector<8x32xf32> to vector<1x8x32xf32>
    tpu.vector_store %arg7[%c0_15, %c0_16, %c0_17], %35 {strides = array<i32>} : memref<1x8x32xf32, #tpu.memory_space<vmem>>, vector<1x8x32xf32>,
    return
  }
  func.func @transform_0(%arg0: i32, %arg1: i32, %arg2: memref<2x8xi32, #tpu.memory_space<smem>>) -> (i32, i32) {
    %c0_i32 = arith.constant 0 : i32
    %c0_i32_0 = arith.constant 0 : i32
    %c0_i32_1 = arith.constant 0 : i32
    return %c0_i32, %c0_i32_0 : i32, i32
  }
  func.func @transform_1(%arg0: i32, %arg1: i32, %arg2: memref<2x8xi32, #tpu.memory_space<smem>>) -> (i32, i32) {
    %c0_i32 = arith.constant 0 : i32
    %c0_i32_0 = arith.constant 0 : i32
    return %arg1, %c0_i32 : i32, i32
  }
  func.func @transform_2(%arg0: i32, %arg1: i32, %arg2: memref<2x8xi32, #tpu.memory_space<smem>>) -> (i32, i32) {
    %c0_i32 = arith.constant 0 : i32
    %c0_i32_0 = arith.constant 0 : i32
    %c0_i32_1 = arith.constant 0 : i32
    return %c0_i32, %c0_i32_0 : i32, i32
  }
  func.func @transform_3(%arg0: i32, %arg1: i32, %arg2: memref<2x8xi32, #tpu.memory_space<smem>>) -> (i32, i32) {
    %c0_i32 = arith.constant 0 : i32
    %c0_i32_0 = arith.constant 0 : i32
    %c0_i32_1 = arith.constant 0 : i32
    return %c0_i32, %c0_i32_0 : i32, i32
  }
  func.func @transform_4(%arg0: i32, %arg1: i32, %arg2: memref<2x8xi32, #tpu.memory_space<smem>>) -> (i32, i32, i32) {
    %c0_i32 = arith.constant 0 : i32
    %c0_i32_0 = arith.constant 0 : i32
    return %arg0, %arg1, %c0_i32 : i32, i32, i32
  }
}

module attributes {stable_mosaic.version = 11 : i64} {
  func.func @sub_lse_kernel(%arg0: i32, %arg1: i32, %arg2: memref<8x128xf32, #tpu.memory_space<vmem>>, %arg3: memref<8x1xf32, #tpu.memory_space<vmem>>, %arg4: memref<8x128xf32, #tpu.memory_space<vmem>>) attributes {dimension_semantics = [#tpu.dimension_semantics<parallel>, #tpu.dimension_semantics<parallel>], iteration_bounds = array<i64: 2, 3>, scalar_prefetch = 0 : i64, scratch_operands = 0 : i64, tpu.core_type = #tpu.core_type<tc>, window_params = [{transform_indices = @transform_0, window_bounds = array<i64: 8, 128>}, {transform_indices = @transform_1, window_bounds = array<i64: 8, 1>}, {transform_indices = @transform_2, window_bounds = array<i64: 8, 128>}]} {
    %c0 = arith.constant 0 : index
    %c0_0 = arith.constant 0 : index
    %0 = vector.load %arg2[%c0, %c0_0] : memref<8x128xf32, #tpu.memory_space<vmem>>, vector<8x128xf32>
    %c0_1 = arith.constant 0 : index
    %c0_2 = arith.constant 0 : index
    %1 = vector.load %arg3[%c0_1, %c0_2] : memref<8x1xf32, #tpu.memory_space<vmem>>, vector<8x1xf32>
    %2 = vector.broadcast %1 : vector<8x1xf32> to vector<8x128xf32>
    %3 = arith.subf %0, %2 : vector<8x128xf32>
    %c0_3 = arith.constant 0 : index
    %c0_4 = arith.constant 0 : index
    %4 = vector.load %arg4[%c0_3, %c0_4] : memref<8x128xf32, #tpu.memory_space<vmem>>, vector<8x128xf32>
    tpu.vector_store %arg4[%c0_3, %c0_4], %3 {strides = array<i32>} : memref<8x128xf32, #tpu.memory_space<vmem>>, vector<8x128xf32>,
    return
  }
  func.func @transform_0(%arg0: i32, %arg1: i32) -> (i32, i32) {
    %c0_i32 = arith.constant 0 : i32
    return %arg0, %arg1 : i32, i32
  }
  func.func @transform_1(%arg0: i32, %arg1: i32) -> (i32, i32) {
    %c0_i32 = arith.constant 0 : i32
    %c0_i32_0 = arith.constant 0 : i32
    return %arg0, %c0_i32 : i32, i32
  }
  func.func @transform_2(%arg0: i32, %arg1: i32) -> (i32, i32) {
    %c0_i32 = arith.constant 0 : i32
    return %arg0, %arg1 : i32, i32
  }
}

</mosaic_0001>

<bundles_post_ra>
// kernel: transformer_forward.3
= control target key start
LH: loop header
LB: loop body
LE: loop exit
PB: predicated region body
PF: predicated region fallthrough
CT: control target
= control target key end

     0   :  { %s539_s0 = inlined_call_operand.vmem [shape: s32[2,8], index: 0, kind: input, shape index: {}]   ;;  %s540_s1 = inlined_call_operand.vmem [shape: f32[384,32], index: 1, kind: input, shape index: {}]   ;;  %s541_s2 = inlined_call_operand.vmem [shape: f32[8,32], index: 2, kind: input, shape index: {}]   ;;  %s542_s3 = inlined_call_operand.<no memory space> [shape: f32[1,1], index: 3, kind: input, shape index: {}]   ;;  %s543_s4 = inlined_call_operand.<no memory space> [shape: f32[1,1], index: 4, kind: input, shape index: {}]   ;;  %s544_s5 = inlined_call_operand.vmem [shape: f32[2,8,32], index: 5, kind: output, shape index: {}]  }
   0x1   :  { %s10_s20 = sshll.u32 %s539_s0, 4  ;;  %14 = sst [smem:[#allocation5]] %s542_s3  ;;  %s11_s20 = int_to_ptr.vmem [resolvable:$true] %s10_s20 }
   0x2   :  { %15 = sst [smem:[#allocation6]] %s543_s4  ;;  %s406_s25 = scalar_lea.vmem %s11_s20, 32 }
   0x3   :  { %p407_p0 = scmp.ne.s32.totalorder %s11_s20, %s406_s25  ;;  %p411_p1 = scmp.lt.s32.totalorder %s11_s20, %s11_s20 }
   0x4   :  { %p412_p2 = scmp.lt.s32.totalorder %s406_s25, %s406_s25 }
   0x6   :  { %p413_p3 = por %p412_p2, %p411_p1 }
   0x8   :  { %p414_p4 = pnand %p413_p3, %p407_p0 }
   0xa   :  { %417 = shalt.err (!%p414_p4)  }
   0xb   :  { %s452_s26 = smov [#allocation4]  }
   0xc   :  { %13 = dma.vmem_to_smem %s11_s20, 32, %s452_s26, [#allocation3] }
   0xd   :  { %434 = dma.done.wait [#allocation3], 32 }
   0xe   :  { %435 = vsyncadd [#allocation3], 4294967264 }
   0xf   :  { %17 = sfence }
  0x10   :  { %s492_s0 = smov 0   ;;  %s494_s3 = smov 0  }
  0x11   :  { %s496_s27 = smov 0  }
  0x12 LB: > { %s35_s4 = sadd.s32 1, %s442_s3  ;;  %p364_p5 = scmp.ge.s32.totalorder %s446_s27, 1  ;;  %s446_s27 = sphi %s496_s27, %s23_s27   ;;  %s442_s3 = sphi %s494_s3, %s546_s3   ;;  %s438_s0 = sphi %s492_s0, %s545_s0  }
  0x13   : > { %p37_p6 = scmp.ge.s32.totalorder %s35_s4, 2  ;;  %p184_p7 = scmp.lt.s32.totalorder %s446_s27, 3 }
  0x15   : > { %s548_s4 = smov (%p37_p6, %s35_s4), 0  ;;  %p185_p8 = pnand %p364_p5, %p184_p7 }
  0x16   : > { %p215_p9 = scmp.lt.s32.totalorder (!%p185_p8), %s438_s0, 1  ;;  %s448_s8 = smov (!%p185_p8), 0  }
  0x17   : > { %188 = sbr.rel (%p185_p8) target bundleno = 385 (0x181), region = 36 }
  0x1e   : > { %s216_s28 = scalar_select %p215_p9, %s438_s0, 1 }
  0x20   : > { %s365_s29 = sshll.u32 %s216_s28, 3 }
  0x21   : > { %s517_s7 = scalar_lea.vmem %s544_s5, %s365_s29 }
  0x22 LB: >> { %s230_s9 = sshra.s32 %s450_s8, 7  ;;  %s235_s10 = sand.u32 127, %s450_s8  ;;  %vm241_vm0 = vcmask 253952   ;;  %s450_s8 = sphi %s448_s8, %s228_s8  }
  0x23   : >> { %s232_s11 = sadd.s32 %s438_s0, %s230_s9  ;;  %s240_s18 = scalar_lea.vmem [#allocation2], %s450_s8 }
  0x24   : >> { %s366_s12 = sshll.u32 %s232_s11, 7  ;;  %s228_s8 = sadd.s32 1, %s450_s8  }
  0x25   : >> { %s236_s13 = sadd.s32 %s366_s12, %s235_s10  ;;  %p225_p10 = scmp.ge.s32.totalorder %s228_s8, 8  }
  0x26   : >> { %s237_s14 = sld [smem:[#allocation4 + %s236_s13]]  ;;  %v245_v2 = vld [vmem:[%s541_s2] sm:$0xff] (%p225_p10)  ;;  %vm249_vm1 = vcmask (%p225_p10), 261120  }
  0x27   : > { %s247_s21 = sld [smem:[#allocation5]] (%p225_p10) }
  0x28   : > { %227 = sbr.rel (!%p225_p10) target bundleno = 34 (0x22), region = 75  ;;  %s248_s22 = sld [smem:[#allocation6]] (%p225_p10) }
  0x2c   : >> { %s238_s17 = scalar_lea.vmem %s540_s1, %s237_s14 }
  0x2d   : >> { %v239_v0 = vld [vmem:[%s238_s17] sm:$0x1]  ;;  %v272_v19 = vstv (%p225_p10), %s247_s21 }
  0x2e   : >> { %242 = vst.msk [vmem:[%s240_s18] sm:$0x1] %vm241_vm0, %v239_v0  ;;  %v275_v22 = vstv (%p225_p10), %s248_s22 }
  0x35   : > { %v243_v1 = vld [vmem:[#allocation2] sm:$0xff] }
  0x36   : > { %v244_v3 = vmul.f32 5.656854, %v243_v1 }
  0x38   : > { %v246_v4 = vadd.f32 %v245_v2, %v244_v3 }
  0x3a   : > { %v250_v5 = vsel %vm249_vm1, %v246_v4, 0.0 }
  0x3b   : > { %251 = vadd.xlane.f32.xlu0 %v250_v5 }
  0xc8   : > { %v252_v6 = vpop.xlane.xlu0 %251 }
  0xc9   : > { %v254_v7 = vmul.f32 0.03125, %v252_v6 }
  0xcb   : > { %v255_v8 = vsub.f32 %v246_v4, %v254_v7 }
  0xcd   : > { %v256_v9 = vmul.f32 %v255_v8, %v255_v8  ;;  %v273_v20 = vmul.f32 %v272_v19, %v255_v8 }
  0xcf   : > { %v257_v10 = vsel %vm249_vm1, %v256_v9, 0.0 }
  0xd0   : > { %258 = vadd.xlane.f32.xlu0 %v257_v10 }
 0x15d   : > { %v259_v11 = vpop.xlane.xlu0 %258 }
 0x15e   : > { %v261_v12 = vmul.f32 0.032258064, %v259_v11 }
 0x160   : > { %402 = vrsqrt.f32 %v261_v12  ;;  %vm264_vm2 = vcmp.eq.f32.partialorder %v261_v12, inf  ;;  %v267_v15 = vand.u32 2147483648, %v261_v12  ;;  %vm266_vm3 = vcmp.eq.f32.partialorder %v261_v12, 0.0 }
 0x16a   : > { %v403_v13 = vpop.eup %402 }
 0x16b   : > { %v263_v14 = vmul.f32 %v403_v13, %v261_v12 }
 0x16d   : > { %v265_v16 = vsel %vm264_vm2, %v261_v12, %v263_v14 }
 0x16e   : > { %v268_v17 = vsel %vm266_vm3, %v267_v15, %v265_v16 }
 0x16f   : > { %v269_v18 = vadd.f32 1e-06, %v268_v17 }
 0x171   : > { %404 = vrcp.f32 %v269_v18 }
 0x17b   : > { %v405_v21 = vpop.eup %404 }
 0x17c   : > { %v274_v23 = vmul.f32 %v405_v21, %v273_v20 }
 0x17e   : > { %v276_v24 = vadd.f32 %v275_v22, %v274_v23 }
 0x180   : > { %277 = vst.msk [vmem:[%s517_s7] sm:$0xff] %vm249_vm1, %v276_v24 }
 0x181 PF: > { %s23_s27 = sadd.s32 1, %s446_s27   ;;  %s545_s0 = smov %s442_s3 }
 0x182   : > { %p20_p11 = scmp.ge.s32.totalorder %s23_s27, 4   ;;  %s546_s3 = smov %s548_s4 }
 0x184   :  { %22 = sbr.rel (!%p20_p11) target bundleno = 18 (0x12), region = 86 }

// kernel: transformer_forward.4
= control target key start
LH: loop header
LB: loop body
LE: loop exit
PB: predicated region body
PF: predicated region fallthrough
CT: control target
= control target key end

     0   :  { %s858_s0 = inlined_call_operand.vmem [shape: f32[16,32], index: 0, kind: input, shape index: {}]   ;;  %s859_s1 = inlined_call_operand.vmem [shape: bf16[32,384], index: 1, kind: input, shape index: {}]   ;;  %s860_s2 = inlined_call_operand.vmem [shape: f32[1,384], index: 2, kind: input, shape index: {}]   ;;  %s861_s3 = inlined_call_operand.vmem [shape: f32[16,384], index: 3, kind: output, shape index: {0}]   ;;  %s862_s4 = inlined_call_operand.vmem [shape: f32[16,1], index: 4, kind: output, shape index: {1}]  }
   0x1   :  { %863 = sst [smem:[#allocation5_spill]] %s859_s1 }
   0x2   :  { %s749_s15 = smov 0   ;;  %s751_s16 = smov 0  }
   0x3   :  { %s753_s17 = smov 0   ;;  %s755_s18 = smov 0  }
   0x4   :  { %s757_s19 = smov 0   ;;  %s759_s20 = smov 0  }
   0x5   :  { %s761_s21 = smov 0  }
   0x6 LB: > { %s24_s22 = sadd.s32 1, %s709_s19  ;;  %s27_s23 = sadd.s32 1, %s713_s20  ;;  %s717_s21 = sphi %s761_s21, %s15_s21   ;;  %s713_s20 = sphi %s759_s20, %s870_s20   ;;  %s709_s19 = sphi %s757_s19, %s869_s19   ;;  %s705_s18 = sphi %s755_s18, %s868_s18   ;;  %s701_s17 = sphi %s753_s17, %s867_s17   ;;  %s697_s16 = sphi %s751_s16, %s866_s16   ;;  %s693_s15 = sphi %s749_s15, %s865_s15  }
   0x7   : > { %p25_p0 = scmp.ge.s32.totalorder %s24_s22, 3  ;;  %s60_s24 = sadd.s32 1, %s697_s16 }
   0x8   : > { %p67_p1 = scmp.ne.s32.totalorder %s697_s16, %s693_s15  ;;  %p68_p2 = scmp.eq.s32.totalorder %s717_s21, 0 }
   0x9   : > { %s872_s22 = smov (%p25_p0, %s24_s22), 0  ;;  %s874_s23 = smov (!%p25_p0, %s27_s23), %s713_s20 }
   0xa   : > { %s57_s25 = ssub.s32 %s709_s19, %s872_s22  ;;  %p69_p3 = por %p68_p2, %p67_p1 }
   0xb   : > { %p29_p4 = scmp.ge.s32.totalorder %s874_s23, 2  ;;  %p58_p5 = scmp.eq.s32.totalorder %s57_s25, 0 }
   0xc   : > { %p565_p6 = scmp.ge.s32.totalorder %s717_s21, 6 }
   0xd   : > { %s876_s23 = smov (%p29_p4, %s874_s23), 0 }
   0xe   : > { %s798_s26 = scalar_select %p58_p5, %s697_s16, %s60_s24  }
   0xf   : > { %173 = sbr.rel (%p565_p6) target bundleno = 34 (0x22), region = 16 }
  0x16   : > { %183 = sbr.rel (!%p69_p3) target bundleno = 34 (0x22), region = 24  ;;  %s185_s27 = sand.u32 (%p69_p3), 1, %s697_s16  }
  0x17   : > { %s567_s28 = sshll.u32 (%p69_p3), %s709_s19, 2  ;;  %s566_s29 = sshll.u32 (%p69_p3), %s185_s27, 4 }
  0x18   : > { %s864_s1 = sld [smem:[#allocation5_spill]] (%p69_p3)  ;;  %s187_s7 = scalar_lea.vmem (%p69_p3), [#allocation4], %s566_s29 }
  0x1e   : > { %s189_s6 = scalar_lea.vmem %s864_s1, %s567_s28 }
  0x1f   : > { %v205_v0 = vld [vmem:[%s189_s6] sm:$0xf]  ;;  %v207_v1 = vld [vmem:[%s189_s6 + $0xc] sm:$0xf]  ;;  %v209_v2 = vld [vmem:[%s189_s6 + $0x18] sm:$0xf] }
  0x20   : > { %206 = vst [vmem:[%s187_s7] sm:$0xf] %v205_v0  ;;  %208 = vst [vmem:[%s187_s7 + $0x4] sm:$0xf] %v207_v1  ;;  %v211_v3 = vld [vmem:[%s189_s6 + $0x24] sm:$0xf] }
  0x21   : > { %210 = vst [vmem:[%s187_s7 + $0x8] sm:$0xf] %v209_v2  ;;  %212 = vst [vmem:[%s187_s7 + $0xc] sm:$0xf] %v211_v3 }
  0x22 PF: > { %p568_p7 = scmp.ge.s32.totalorder %s717_s21, 1  ;;  %p248_p8 = scmp.lt.s32.totalorder %s717_s21, 7 }
  0x24   : > { %p249_p9 = pnand %p568_p7, %p248_p8 }
  0x25   : > { %s255_s8 = sand.u32 (!%p249_p9), 1, %s693_s15   ;;  %p294_p10 = scmp.lt.s32.totalorder (!%p249_p9), %s705_s18, 1 }
  0x26   : > { %252 = sbr.rel (%p249_p9) target bundleno = 730 (0x2da), region = 69  ;;  %s569_s9 = sshll.u32 (!%p249_p9), %s255_s8, 4 }
  0x27   : > { %p298_p11 = scmp.lt.s32.totalorder (!%p249_p9), %s701_s17, 2  ;;  %p573_p12 = scmp.ne.s32.totalorder (!%p249_p9), %s701_s17, 0 }
  0x2d   : > { %s878_s18 = smov (!%p294_p10, %s705_s18), 1  ;;  %317 = sbr.rel (%p573_p12) target bundleno = 52 (0x34), region = 77 }
  0x2e   : > { %s813_s10 = scalar_select %p298_p11, %s701_s17, 2 }
  0x2f   : > { %s570_s11 = sshll.u32 %s878_s18, 3  ;;  %s592_s12 = smul.u32 3, %s878_s18  ;;  %vm318_vm0 = vcmask (!%p573_p12), 7168   ;;  %v719_v4 = vmov (!%p573_p12), -inf   ;;  %v720_v5 = vmov (!%p573_p12), 0.0  }
  0x30   : > { %s297_s24 = scalar_lea.vmem %s858_s0, %s570_s11  ;;  %s300_s28 = scalar_lea.vmem %s860_s2, %s813_s10  ;;  %319 = vst.msk [vmem:[#allocation2] sm:$0xff] (!%p573_p12), %vm318_vm0, %v719_v4  ;;  %320 = vst.msk [vmem:[#allocation3] sm:$0xff] (!%p573_p12), %vm318_vm0, %v720_v5 }
  0x31   : > { %s306_s29 = sadd.s32 %s592_s12, %s813_s10  ;;  %s826_s5 = scalar_lea.vmem %s862_s4, %s570_s11 }
  0x32   : > { %s571_s6 = sshll.u32 %s306_s29, 3  ;;  %s257_s18 = scalar_lea.vmem [#allocation4], %s569_s9 }
  0x33   : > { %s308_s1 = scalar_lea.vmem %s861_s3, %s571_s6 }
  0x34 PF: > { %v655_v6 = vld [vmem:[%s257_s18] sm:$0xff]   ;;  %v721_v7 = vmov 0.0   ;;  %v656_v8 = vld [vmem:[%s257_s18 + $0x8] sm:$0xff]   ;;  %vm722_vm1 = vmmov 0   ;;  %vm346_vm2 = vcmask 261120   ;;  %v723_v17 = vmov 0  }
  0x35   : > { %584 = vmatprep.subr.bf16.mxu0 %v721_v7  ;;  %588 = vmatprep.mubr.msk.bf16.mxu0 %vm722_vm1, %v721_v7  ;;  %v321_v9 = vld [vmem:[%s297_s24] sm:$0xff]  ;;  %vm411_vm3 = vcmask 7168   ;;  %p578_p13 = scmp.ne.s32.totalorder %s701_s17, 2 }
  0x36   : > { %585 = vmatpush3.bf16.msra.mxu0 %v655_v6  ;;  %v322_v10 = vpack.c.bf16 %v321_v9, %v321_v9  ;;  %v574_v11 = vld [vmem:[%s300_s28] ss:$0 sm:$0xff]  ;;  %654 = vset.pattern.permute.xlu0 %v723_v17 }
  0x37   : > { %586 = vmatprep.subr.bf16.mxu0 %v721_v7  ;;  %v391_v18 = vld [vmem:[#allocation2] sm:$0xff]  ;;  %v395_v28 = vld [vmem:[#allocation3] sm:$0xff] }
  0x3a   : > { %587 = vmatpush3.bf16.msra.mxu0 %v656_v8 }
  0x3d   : > { %589 = vmatmul.mubr.msk.bf16.vlgmr.msra.gmra.mrb[0].mxu0 %vm346_vm2, %v322_v10 }
 0x110   : > { %v384_v12 = vpop.f32.mrb[0].mxu0 }
 0x111   : > { %v385_v13 = vadd.f32 %v574_v11, %v384_v12  ;;  %v590_v14 = vpop.f32.mrb[1].mxu0 }
 0x112   : > { %v387_v15 = vpop.f32.mrb[2].mxu0 }
 0x113   : > { %390 = vst [vmem:[%s308_s1] sm:$0xff] %v385_v13  ;;  %392 = vmax.xlane.f32.xlu0 %v385_v13  ;;  %v591_v16 = vpop.f32.mrb[3].mxu0 }
 0x1a0   : > { %v393_v19 = vpop.xlane.xlu0 %392 }
 0x1a1   : > { %v394_v20 = vmax.f32 %v391_v18, %v393_v19 }
 0x1a3   : > { %v396_v21 = vsub.f32 %v391_v18, %v394_v20  ;;  %413 = vst.msk [vmem:[#allocation2] sm:$0xff] %vm411_vm3, %v394_v20  ;;  %402 = vperm.xlu0 %654, %v394_v20  }
 0x1a5   : > { %v397_v26 = vmul.f32 1.442695, %v396_v21 }
 0x1aa   : > { %v418_v34 = vld [vmem:[#allocation2] sm:$0xff] (!%p578_p13) }
 0x222   : > { %v403_v22 = vpop.permute.xlu0 %402 }
 0x223   : > { %v405_v23 = vsub.f32 %v385_v13, %v403_v22 }
 0x225   : > { %v406_v24 = vmul.f32 1.442695, %v405_v23 }
 0x227   : > { %657 = vpow2.f32 %v406_v24 }
 0x228   : > { %659 = vpow2.f32 %v397_v26 }
 0x231   : > { %v658_v25 = vpop.eup %657 }
 0x232   : > { %408 = vadd.xlane.f32.xlu1 %v658_v25  ;;  %v660_v27 = vpop.eup %659 }
 0x233   : > { %v399_v29 = vmul.f32 %v660_v27, %v395_v28 }
 0x2bc   : > { %417 = sbr.rel (%p578_p13) target bundleno = 730 (0x2da), region = 81 }
 0x2bf   : > { %v409_v30 = vpop.xlane.xlu1 %408 }
 0x2c0   : > { %v410_v31 = vadd.f32 %v409_v30, %v399_v29 }
 0x2c2   : > { %412 = vst.msk [vmem:[#allocation3] sm:$0xff] %vm411_vm3, %v410_v31 }
 0x2c9   : > { %v419_v32 = vld [vmem:[#allocation3] sm:$0xff] }
 0x2ca   : > { %661 = vlog2.f32 %v419_v32 }
 0x2d4   : > { %v662_v33 = vpop.eup %661 }
 0x2d5   : > { %v421_v35 = vmul.f32 0.6931472, %v662_v33 }
 0x2d7   : > { %v422_v36 = vadd.f32 %v421_v35, %v418_v34 }
 0x2d9   : > { %423 = vst.msk [vmem:[%s826_s5] sm:$0xff] %vm411_vm3, %v422_v36 }
 0x2da PF: > { %s15_s21 = sadd.s32 1, %s717_s21   ;;  %s865_s15 = smov %s697_s16 }
 0x2db   : > { %p12_p0 = scmp.ge.s32.totalorder %s15_s21, 8   ;;  %s866_s16 = smov %s798_s26 }
 0x2dc   : > { %s867_s17 = smov %s709_s19  ;;  %s868_s18 = smov %s713_s20 }
 0x2dd   : > { %s869_s19 = smov %s872_s22  ;;  %s870_s20 = smov %s876_s23 }
 0x2de   :  { %14 = sbr.rel (!%p12_p0) target bundleno = 6 (0x6), region = 134 }

// kernel: transformer_forward.5
= control target key start
LH: loop header
LB: loop body
LE: loop exit
PB: predicated region body
PF: predicated region fallthrough
CT: control target
= control target key end

     0   :  { %7 = vsyncpa [#allocation3], 0  ;;  %s639_s0 = inlined_call_operand.vmem [shape: f32[16,384], index: 0, kind: input, shape index: {}]   ;;  %s640_s1 = inlined_call_operand.vmem [shape: f32[16,1], index: 1, kind: input, shape index: {}]   ;;  %s641_s2 = inlined_call_operand.hbm [shape: f32[16,384], index: 2, kind: output, shape index: {}]  }
   0x1   :  { %9 = vsyncpa [#allocation3 + $0x1], 0  ;;  %s499_s9 = smov 0   ;;  %s501_s10 = smov 0  }
   0x2   :  { %s503_s11 = smov 0   ;;  %s505_s12 = smov 0  }
   0x3   :  { %s507_s13 = smov 0   ;;  %s509_s14 = smov 0  }
   0x4   :  { %s511_s15 = smov 0   ;;  %s513_s16 = smov 0  }
   0x5 LB: > { %s299_s17 = sadd.s32 4294967295, %s480_s16   ;;  %s300_s18 = sadd.s32 4294967294, %s480_s16   ;;  %s480_s16 = sphi %s513_s16, %s15_s16   ;;  %s476_s15 = sphi %s511_s15, %s656_s15   ;;  %s472_s14 = sphi %s509_s14, %s655_s14   ;;  %s468_s13 = sphi %s507_s13, %s654_s13   ;;  %s464_s12 = sphi %s505_s12, %s653_s12   ;;  %s460_s11 = sphi %s503_s11, %s652_s11   ;;  %s456_s10 = sphi %s501_s10, %s651_s10   ;;  %s452_s9 = sphi %s499_s9, %s650_s9  }
   0x6   : > { %s24_s19 = sadd.s32 1, %s472_s14  ;;  %s27_s20 = sadd.s32 1, %s476_s15 }
   0x7   : > { %p25_p0 = scmp.ge.s32.totalorder %s24_s19, 3  ;;  %p100_p1 = scmp.ne.s32.totalorder %s460_s11, %s456_s10 }
   0x8   : > { %p101_p2 = scmp.eq.s32.totalorder %s299_s17, 5  ;;  %p106_p5 = scmp.ne.s32.totalorder %s456_s10, %s452_s9 }
   0x9   : > { %s658_s19 = smov (%p25_p0, %s24_s19), 0  ;;  %s660_s20 = smov (!%p25_p0, %s27_s20), %s476_s15 }
   0xa   : > { %644 = sst [smem:[#allocation5_spill]] %s658_s19  ;;  %s86_s21 = ssub.s32 %s472_s14, %s658_s19 }
   0xb   : > { %p550_p3 = por %p101_p2, %p100_p1  ;;  %p29_p4 = scmp.ge.s32.totalorder %s660_s20, 2 }
   0xc   : > { %p107_p6 = scmp.eq.s32.totalorder %s300_s18, 5  ;;  %p303_p7 = scmp.ge.s32.totalorder %s480_s16, 1 }
   0xd   : > { %s662_s20 = smov (%p29_p4, %s660_s20), 0  ;;  %p143_p9 = scmp.lt.s32.totalorder %s480_s16, 7 }
   0xe   : > { %646 = sst [smem:[#allocation6_spill]] %s662_s20  ;;  %p559_p8 = por %p107_p6, %p106_p5 }
   0xf   : > { %s85_s24 = ssub.s32 %s476_s15, %s662_s20  ;;  %s90_s25 = sadd.s32 1, %s460_s11 }
  0x10   : > { %s87_s26 = sor.u32 %s86_s21, %s85_s24  ;;  %p144_p10 = pnand %p303_p7, %p143_p9 }
  0x11   : > { %p88_p11 = scmp.eq.s32.totalorder %s87_s26, 0  ;;  %p172_p12 = scmp.lt.s32.totalorder (!%p144_p10), %s468_s13, 1  ;;  %v482_v0 = vmov (!%p144_p10), 0  }
  0x12   : > { %147 = sbr.rel (%p144_p10) target bundleno = 174 (0xae), region = 28  ;;  %385 = vset.pattern.permute.xlu0 (!%p144_p10), %v482_v0  ;;  %p174_p13 = scmp.lt.s32.totalorder (!%p144_p10), %s464_s12, 2 }
  0x13   : > { %s568_s27 = scalar_select %p88_p11, %s460_s11, %s90_s25  }
  0x14   : > { %s169_s7 = sand.u32 (!%p144_p10), 1, %s456_s10   ;;  %s312_s18 = smul.u32 (!%p144_p10), 3, %s468_s13 }
  0x15   : > { %s304_s17 = sshll.u32 (!%p144_p10), %s169_s7, 3 }
  0x16   : > { %s205_s20 = sadd.s32 (!%p144_p10), %s464_s12, %s312_s18  ;;  %s171_s30 = scalar_lea.vmem (!%p144_p10), [#allocation2], %s304_s17 }
  0x17   : > { %s308_s19 = sshll.u32 (!%p144_p10), %s205_s20, 7 }
  0x19   : > { %s173_s28 = scalar_select %p172_p12, %s468_s13, 1 }
  0x1a   : > { %s175_s5 = scalar_select %p174_p13, %s464_s12, 2 }
  0x1b   : > { %s306_s29 = sshll.u32 %s173_s28, 3  ;;  %s311_s6 = smul.u32 3, %s173_s28 }
  0x1c   : > { %s183_s4 = scalar_lea.vmem %s640_s1, %s306_s29  ;;  %s209_s29 = sshll.u32 %s171_s30, 4  ;;  %s588_s29 = int_to_ptr.vmem [resolvable:$true] %s209_s29 }
  0x1d   : > { %v185_v1 = vld [vmem:[%s183_s4] sm:$0xff]  ;;  %s177_s8 = sadd.s32 %s311_s6, %s175_s5  ;;  %s586_s28 = scalar_lea.hbm %s641_s2, %s308_s19 }
  0x1e   : > { %188 = vperm.xlu0 %385, %v185_v1   ;;  %s305_s21 = sshll.u32 %s177_s8, 3  ;;  %s194_s13 = scalar_lea.sflag [#allocation3], %s169_s7 }
  0x1f   : > { %s179_s26 = scalar_lea.vmem %s639_s0, %s305_s21  ;;  %s386_s5 = scalar_lea.vmem %s588_s29, 128 }
  0x20   : > { %v184_v2 = vld [vmem:[%s179_s26] sm:$0xff]  ;;  %p387_p0 = scmp.ne.s32.totalorder %s588_s29, %s386_s5  ;;  %s483_s12 = smov [#allocation2]  }
  0x21   : > { %s390_s20 = sshll.u32 %s483_s12, 4  ;;  %s391_s20 = int_to_ptr.vmem [resolvable:$false] %s390_s20 }
  0x22   : > { %p388_p1 = pnand %p387_p0, %p550_p3  ;;  %s392_s6 = scalar_lea.vmem %s391_s20, 256 }
  0x23   : > { %p393_p4 = scmp.lt.s32.totalorder %s588_s29, %s391_s20  ;;  %p394_p5 = scmp.lt.s32.totalorder %s392_s6, %s386_s5 }
  0x24   : > { %p389_p2 = pneg %p388_p1 }
  0x25   : > { %p395_p6 = por %p394_p5, %p393_p4 }
  0x27   : > { %p396_p7 = pnand %p395_p6, %p389_p2 }
  0x9d   : > { %v189_v3 = vpop.permute.xlu0 %188 }
  0x9e   : > { %v191_v4 = vsub.f32 %v184_v2, %v189_v3 }
  0xa0   : > { %192 = vst [vmem:[%s171_s30] sm:$0xff] %v191_v4 }
  0xa1   : > { %399 = shalt.err (!%p396_p7)
}
  0xa2   : > { %s400_s19 = scalar_lea.hbm %s586_s28, 128  ;;  %s404_s17 = scalar_lea.hbm %s641_s2, 768 }
  0xa3   : > { %p401_p9 = scmp.ne.s32.totalorder %s586_s28, %s400_s19  ;;  %p405_p12 = scmp.lt.u32.totalorder %s586_s28, %s641_s2 }
  0xa4   : > { %p406_p13 = scmp.lt.u32.totalorder %s404_s17, %s400_s19  ;;  %p408_p1 = scmp.lt.u32.totalorder %s400_s19, %s586_s28 }
  0xa5   : > { %p402_p10 = pnand %p401_p9, %p550_p3 }
  0xa6   : > { %p407_p0 = por %p406_p13, %p405_p12 }
  0xa7   : > { %p403_p11 = pneg %p402_p10 }
  0xa8   : > { %p409_p2 = por %p408_p1, %p407_p0 }
  0xaa   : > { %p410_p4 = pnand %p409_p2, %p403_p11 }
  0xac   : > { %413 = shalt.err (!%p410_p4)
}
  0xad   : > { %313 = dma.vmem_to_hbm [thread:$0]  (%p550_p3), %s588_s29, 128, %s586_s28, %s194_s13  }
  0xae PF: > { %p319_p5 = scmp.ge.s32.totalorder %s480_s16, 2  ;;  %s221_s24 = sand.u32 1, %s452_s9  }
  0xaf   : > { %s222_s25 = scalar_lea.sflag [#allocation3], %s221_s24 }
  0xb0   : > { %p316_p6 = pnand %p319_p5, %p559_p8 }
  0xb2   : > { %447 = dma.done.wait (!%p316_p6), %s222_s25, 128  }
  0xb3   : > { %449 = vsyncadd (!%p316_p6), %s222_s25, 4294967168  ;;  %s15_s16 = sadd.s32 1, %s480_s16   ;;  %s648_s22 = sld [smem:[#allocation5_spill]] }
  0xb4   : > { %p12_p7 = scmp.ge.s32.totalorder %s15_s16, 8   ;;  %s649_s26 = sld [smem:[#allocation6_spill]] }
  0xb5   : > { %s650_s9 = smov %s456_s10  ;;  %s651_s10 = smov %s460_s11 }
  0xb6   : > { %s652_s11 = smov %s568_s27  ;;  %s653_s12 = smov %s472_s14 }
  0xb7   : > { %s654_s13 = smov %s476_s15  ;;  %14 = sbr.rel (!%p12_p7) target bundleno = 5 (0x5), region = 66 }
  0xb9   : > { %s655_s14 = smov %s648_s22 }
  0xba   : > { %s656_s15 = smov %s649_s26 }
  0xbe   :  { %227 = vsyncpa [#allocation3], 1 }
  0xbf   :  { %229 = vsyncpa [#allocation3 + $0x1], 1 }

</bundles_post_ra>
